<compile_context>
chip_gen: v7x
topology: tpu7x:2x2x1
jax: 0.10.0
libtpu: 0.0.40
codegen_flags: <defaults>
</compile_context>

<pallas_src>
import functools

import jax
import jax.numpy as jnp
from jax.experimental import pallas as pl
from jax.experimental.pallas import tpu as pltpu

_LANE = 128  # vreg lane width: box index maps here
_SUB = 8     # vreg sublane count


def _round_up(x: int, m: int) -> int:
    return ((x + m - 1) // m) * m


def _iou_loss_kernel(pred_ref, target_ref, out_ref, acc_ref, *, loss_type: str):
    # grid = (outer "parallel" axis o, inner "arbitrary" reduction axis i)
    i = pl.program_id(1)

    @pl.when(i == 0)
    def _init():
        acc_ref[...] = jnp.zeros_like(acc_ref)

    # Dense (TR, 128) tiles per coordinate (full sublane + lane utilization).
    pred_x1 = pred_ref[0]
    pred_y1 = pred_ref[1]
    pred_x2 = pred_ref[2]
    pred_y2 = pred_ref[3]
    target_x1 = target_ref[0]
    target_y1 = target_ref[1]
    target_x2 = target_ref[2]
    target_y2 = target_ref[3]

    target_aera = (target_x2 - target_x1) * (target_y2 - target_y1)
    pred_aera = (pred_x2 - pred_x1) * (pred_y2 - pred_y1)

    w_intersect = jnp.minimum(pred_x2, target_x2) - jnp.maximum(pred_x1, target_x1)
    h_intersect = jnp.minimum(pred_y2, target_y2) - jnp.maximum(pred_y1, target_y1)

    g_w_intersect = jnp.maximum(pred_x2, target_x2) - jnp.minimum(pred_x1, target_x1)
    # (intentionally reproduces the y2/x1 mix-up in the reference PyTorch code)
    g_h_intersect = jnp.maximum(pred_y2, target_y2) - jnp.minimum(pred_x1, target_x1)

    ac_uion = g_w_intersect * g_h_intersect
    area_intersect = w_intersect * h_intersect
    area_union = target_aera + pred_aera - area_intersect

    ious = (area_intersect + 1.0) / (area_union + 1.0)

    if loss_type == "iou":
        losses = -jnp.log(ious)
    elif loss_type == "linear_iou":
        losses = 1.0 - ious
    elif loss_type == "giou":
        gious = ious - (ac_uion - area_union) / ac_uion
        losses = 1.0 - gious
    elif loss_type == "diou":
        pred_ctr_x = (pred_x1 + pred_x2) / 2
        pred_ctr_y = (pred_y1 + pred_y2) / 2
        target_ctr_x = (target_x1 + target_x2) / 2
        target_ctr_y = (target_y1 + target_y2) / 2
        rou_square = (target_ctr_x - pred_ctr_x) ** 2 + (target_ctr_y - pred_ctr_y) ** 2
        c_square = g_w_intersect ** 2 + g_h_intersect ** 2
        diou = ious - rou_square / (c_square + 1e-05)
        losses = 1.0 - diou
    else:
        raise Exception(f"Unimplemented iou loss type {loss_type}!!!")

    # Elementwise partial-sum accumulation: no per-step cross-lane reduce and
    # no per-step read-modify-write of a 1-lane output.
    acc_ref[...] = acc_ref[...] + losses

    # Single XLU reduce + tiny store, only at the end of the reduction sweep.
    @pl.when(i == pl.num_programs(1) - 1)
    def _finalize():
        out_ref[...] = jnp.zeros_like(out_ref) + jnp.sum(acc_ref[...])


def iou_loss(pred: jax.Array, target: jax.Array, loss_type: str = "giou",
             *, tr_max: int = 512, num_parallel: int = 2) -> jax.Array:
    """pred, target: (N, 4) boxes [x1, y1, x2, y2]; returns scalar sum of losses."""
    assert pred.shape == target.shape and pred.ndim == 2 and pred.shape[1] == 4
    n = pred.shape[0]
    if n == 0:
        # Empty input: sum over zero boxes is exactly 0 (avoid a zero-size grid).
        return jnp.float32(0.0)

    # --- choose tiling -------------------------------------------------------
    r_needed = -(-n // _LANE)                                # rows of 128 boxes
    tr_cap = max(_SUB, (tr_max // _SUB) * _SUB)              # rows/block, mult. of 8
    tr = min(_round_up(r_needed, _SUB), tr_cap)
    num_blocks = -(-r_needed // tr)
    g_outer = max(1, min(num_parallel, num_blocks))          # megacore split (v7x)
    num_blocks = _round_up(num_blocks, g_outer)
    g_inner = num_blocks // g_outer
    r_pad = num_blocks * tr
    n_pad = r_pad * _LANE

    # --- host-side SoA repack (pad -> transpose -> reshape, fused by XLA) ----
    # Pad with unit boxes [0,0,1,1]: exactly zero loss for every loss type.
    pad_box = jnp.array([0.0, 0.0, 1.0, 1.0], dtype=jnp.float32)

    def to_soa(x):
        x = x.astype(jnp.float32)
        if n_pad > n:
            x = jnp.concatenate([x, jnp.broadcast_to(pad_box, (n_pad - n, 4))], axis=0)
        return x.T.reshape(4, r_pad, _LANE)

    pred_soa = to_soa(pred)
    target_soa = to_soa(target)

    kernel = functools.partial(_iou_loss_kernel, loss_type=loss_type)

    out = pl.pallas_call(
        kernel,
        out_shape=jax.ShapeDtypeStruct((g_outer, 1, 1), jnp.float32),
        grid_spec=pltpu.PrefetchScalarGridSpec(
            num_scalar_prefetch=0,
            grid=(g_outer, g_inner),
            in_specs=[
                pl.BlockSpec((4, tr, _LANE), lambda o, i: (0, o * g_inner + i, 0)),
                pl.BlockSpec((4, tr, _LANE), lambda o, i: (0, o * g_inner + i, 0)),
            ],
            out_specs=pl.BlockSpec((1, 1, 1), lambda o, i: (o, 0, 0)),
            scratch_shapes=[pltpu.VMEM((tr, _LANE), jnp.float32)],
        ),
        compiler_params=pltpu.CompilerParams(
            dimension_semantics=("parallel", "arbitrary"),
        ),
    )(pred_soa, target_soa)

    # Sum the (at most num_parallel) per-core partial sums.
    return out.sum()


def _iou_loss_ref(pred, target, loss_type="giou"):
    """Pure-JAX reference mirroring the PyTorch code (for a sanity check)."""
    pred = pred.astype(jnp.float32)
    target = target.astype(jnp.float32)
    px1, py1, px2, py2 = pred[:, 0], pred[:, 1], pred[:, 2], pred[:, 3]
    tx1, ty1, tx2, ty2 = target[:, 0], target[:, 1], target[:, 2], target[:, 3]
    target_aera = (tx2 - tx1) * (ty2 - ty1)
    pred_aera = (px2 - px1) * (py2 - py1)
    w_i = jnp.minimum(px2, tx2) - jnp.maximum(px1, tx1)
    h_i = jnp.minimum(py2, ty2) - jnp.maximum(py1, ty1)
    g_w = jnp.maximum(px2, tx2) - jnp.minimum(px1, tx1)
    g_h = jnp.maximum(py2, ty2) - jnp.minimum(px1, tx1)
    ac = g_w * g_h
    a_i = w_i * h_i
    a_u = target_aera + pred_aera - a_i
    ious = (a_i + 1.0) / (a_u + 1.0)
    gious = ious - (ac - a_u) / ac
    if loss_type == "giou":
        losses = 1.0 - gious
    elif loss_type == "iou":
        losses = -jnp.log(ious)
    elif loss_type == "linear_iou":
        losses = 1.0 - ious
    elif loss_type == "diou":
        pcx, pcy = (px1 + px2) / 2, (py1 + py2) / 2
        tcx, tcy = (tx1 + tx2) / 2, (ty1 + ty2) / 2
        rou = (tcx - pcx) ** 2 + (tcy - pcy) ** 2
        c2 = g_w ** 2 + g_h ** 2
        losses = 1.0 - (ious - rou / (c2 + 1e-05))
    else:
        raise Exception(loss_type)
    return losses.sum()


def _make_boxes(key, n):
    k1, k2, k3, k4 = jax.random.split(key, 4)
    p_xy = jax.random.uniform(k1, (n, 2), dtype=jnp.float32, minval=0.0, maxval=8.0)
    p_wh = jax.random.uniform(k2, (n, 2), dtype=jnp.float32, minval=1.0, maxval=6.0)
    # Targets overlap the preds (keeps -log(iou) finite for loss_type="iou").
    t_xy = p_xy + jax.random.uniform(k3, (n, 2), dtype=jnp.float32, minval=-0.5, maxval=0.5)
    t_wh = jnp.maximum(
        p_wh + jax.random.uniform(k4, (n, 2), dtype=jnp.float32, minval=-0.5, maxval=0.5),
        1.0,
    )
    pred = jnp.concatenate([p_xy, p_xy + p_wh], axis=1)      # (n, 4)
    target = jnp.concatenate([t_xy, t_xy + t_wh], axis=1)    # (n, 4)
    return pred, target


if __name__ == "__main__":
    key = jax.random.PRNGKey(0)
    key_a, key_b = jax.random.split(key)

    # Small, not a multiple of 128: single-block path.
    N = 300
    pred, target = _make_boxes(key_a, N)
    for lt in ("giou", "linear_iou", "iou", "diou"):
        out = iou_loss(pred, target, loss_type=lt)
        jax.block_until_ready(out)
        ref = _iou_loss_ref(pred, target, loss_type=lt)
        assert jnp.allclose(out, ref, rtol=2e-4, atol=1e-3), (lt, out, ref)

    # Multi-block + 2-way parallel outer axis (small tiles to force grid=(2,2)).
    N2 = 2500
    pred2, target2 = _make_boxes(key_b, N2)
    out2 = iou_loss(pred2, target2, loss_type="giou", tr_max=8, num_parallel=2)
    jax.block_until_ready(out2)
    ref2 = _iou_loss_ref(pred2, target2, loss_type="giou")
    assert jnp.allclose(out2, ref2, rtol=2e-4, atol=1e-3), (out2, ref2)

    print("KERNEL_OK")
</pallas_src>

<mosaic_0001>
module attributes {stable_mosaic.version = 11 : i64} {
  func.func @_iou_loss_kernel(%arg0: i32, %arg1: i32, %arg2: memref<4x8x128xf32, #tpu.memory_space<vmem>>, %arg3: memref<4x8x128xf32, #tpu.memory_space<vmem>>, %arg4: memref<1x1x1xf32, #tpu.memory_space<vmem>>, %arg5: memref<8x128xf32, #tpu.memory_space<vmem>>) attributes {dimension_semantics = [#tpu.dimension_semantics<parallel>, #tpu.dimension_semantics<arbitrary>], iteration_bounds = array<i64: 1, 1>, scalar_prefetch = 0 : i64, scratch_operands = 1 : i64, tpu.core_type = #tpu.core_type<tc>, window_params = [{transform_indices = @transform_0, window_bounds = array<i64: 4, 8, 128>}, {transform_indices = @transform_1, window_bounds = array<i64: 4, 8, 128>}, {transform_indices = @transform_2, window_bounds = array<i64: 1, 1, 1>}]} {
    %c0_i32 = arith.constant 0 : i32
    %0 = arith.cmpi eq, %arg1, %c0_i32 : i32
    %1 = arith.extui %0 : i1 to i32
    %c0_i32_0 = arith.constant 0 : i32
    %2 = arith.cmpi ne, %1, %c0_i32_0 : i32
    scf.if %2 {
      %cst_29 = arith.constant 0.000000e+00 : f32
      %57 = vector.broadcast %cst_29 : f32 to vector<8x128xf32>
      %c0_30 = arith.constant 0 : index
      %c0_31 = arith.constant 0 : index
      %58 = vector.load %arg5[%c0_30, %c0_31] : memref<8x128xf32, #tpu.memory_space<vmem>>, vector<8x128xf32>
      tpu.vector_store %arg5[%c0_30, %c0_31], %57 {strides = array<i32>} : memref<8x128xf32, #tpu.memory_space<vmem>>, vector<8x128xf32>,
    } else {
    }
    %c0 = arith.constant 0 : index
    %c0_1 = arith.constant 0 : index
    %c0_2 = arith.constant 0 : index
    %3 = vector.load %arg2[%c0, %c0_1, %c0_2] : memref<4x8x128xf32, #tpu.memory_space<vmem>>, vector<1x8x128xf32>
    %4 = vector.shape_cast %3 : vector<1x8x128xf32> to vector<8x128xf32>
    %c1 = arith.constant 1 : index
    %c0_3 = arith.constant 0 : index
    %c0_4 = arith.constant 0 : index
    %5 = vector.load %arg2[%c1, %c0_3, %c0_4] : memref<4x8x128xf32, #tpu.memory_space<vmem>>, vector<1x8x128xf32>
    %6 = vector.shape_cast %5 : vector<1x8x128xf32> to vector<8x128xf32>
    %c2 = arith.constant 2 : index
    %c0_5 = arith.constant 0 : index
    %c0_6 = arith.constant 0 : index
    %7 = vector.load %arg2[%c2, %c0_5, %c0_6] : memref<4x8x128xf32, #tpu.memory_space<vmem>>, vector<1x8x128xf32>
    %8 = vector.shape_cast %7 : vector<1x8x128xf32> to vector<8x128xf32>
    %c3 = arith.constant 3 : index
    %c0_7 = arith.constant 0 : index
    %c0_8 = arith.constant 0 : index
    %9 = vector.load %arg2[%c3, %c0_7, %c0_8] : memref<4x8x128xf32, #tpu.memory_space<vmem>>, vector<1x8x128xf32>
    %10 = vector.shape_cast %9 : vector<1x8x128xf32> to vector<8x128xf32>
    %c0_9 = arith.constant 0 : index
    %c0_10 = arith.constant 0 : index
    %c0_11 = arith.constant 0 : index
    %11 = vector.load %arg3[%c0_9, %c0_10, %c0_11] : memref<4x8x128xf32, #tpu.memory_space<vmem>>, vector<1x8x128xf32>
    %12 = vector.shape_cast %11 : vector<1x8x128xf32> to vector<8x128xf32>
    %c1_12 = arith.constant 1 : index
    %c0_13 = arith.constant 0 : index
    %c0_14 = arith.constant 0 : index
    %13 = vector.load %arg3[%c1_12, %c0_13, %c0_14] : memref<4x8x128xf32, #tpu.memory_space<vmem>>, vector<1x8x128xf32>
    %14 = vector.shape_cast %13 : vector<1x8x128xf32> to vector<8x128xf32>
    %c2_15 = arith.constant 2 : index
    %c0_16 = arith.constant 0 : index
    %c0_17 = arith.constant 0 : index
    %15 = vector.load %arg3[%c2_15, %c0_16, %c0_17] : memref<4x8x128xf32, #tpu.memory_space<vmem>>, vector<1x8x128xf32>
    %16 = vector.shape_cast %15 : vector<1x8x128xf32> to vector<8x128xf32>
    %c3_18 = arith.constant 3 : index
    %c0_19 = arith.constant 0 : index
    %c0_20 = arith.constant 0 : index
    %17 = vector.load %arg3[%c3_18, %c0_19, %c0_20] : memref<4x8x128xf32, #tpu.memory_space<vmem>>, vector<1x8x128xf32>
    %18 = vector.shape_cast %17 : vector<1x8x128xf32> to vector<8x128xf32>
    %19 = arith.subf %16, %12 : vector<8x128xf32>
    %20 = arith.subf %18, %14 : vector<8x128xf32>
    %21 = arith.mulf %19, %20 : vector<8x128xf32>
    %22 = arith.subf %8, %4 : vector<8x128xf32>
    %23 = arith.subf %10, %6 : vector<8x128xf32>
    %24 = arith.mulf %22, %23 : vector<8x128xf32>
    %25 = arith.minimumf %8, %16 : vector<8x128xf32>
    %26 = arith.maximumf %4, %12 : vector<8x128xf32>
    %27 = arith.subf %25, %26 : vector<8x128xf32>
    %28 = arith.minimumf %10, %18 : vector<8x128xf32>
    %29 = arith.maximumf %6, %14 : vector<8x128xf32>
    %30 = arith.subf %28, %29 : vector<8x128xf32>
    %31 = arith.maximumf %8, %16 : vector<8x128xf32>
    %32 = arith.minimumf %4, %12 : vector<8x128xf32>
    %33 = arith.subf %31, %32 : vector<8x128xf32>
    %34 = arith.maximumf %10, %18 : vector<8x128xf32>
    %35 = arith.minimumf %4, %12 : vector<8x128xf32>
    %36 = arith.subf %34, %35 : vector<8x128xf32>
    %37 = arith.mulf %33, %36 : vector<8x128xf32>
    %38 = arith.mulf %27, %30 : vector<8x128xf32>
    %39 = arith.addf %21, %24 : vector<8x128xf32>
    %40 = arith.subf %39, %38 : vector<8x128xf32>
    %cst = arith.constant 1.000000e+00 : f32
    %41 = vector.broadcast %cst : f32 to vector<8x128xf32>
    %42 = arith.addf %38, %41 : vector<8x128xf32>
    %cst_21 = arith.constant 1.000000e+00 : f32
    %43 = vector.broadcast %cst_21 : f32 to vector<8x128xf32>
    %44 = arith.addf %40, %43 : vector<8x128xf32>
    %45 = arith.divf %42, %44 : vector<8x128xf32>
    %46 = arith.subf %37, %40 : vector<8x128xf32>
    %47 = arith.divf %46, %37 : vector<8x128xf32>
    %48 = arith.subf %45, %47 : vector<8x128xf32>
    %cst_22 = arith.constant 1.000000e+00 : f32
    %49 = vector.broadcast %cst_22 : f32 to vector<8x128xf32>
    %50 = arith.subf %49, %48 : vector<8x128xf32>
    %c0_23 = arith.constant 0 : index
    %c0_24 = arith.constant 0 : index
    %51 = vector.load %arg5[%c0_23, %c0_24] : memref<8x128xf32, #tpu.memory_space<vmem>>, vector<8x128xf32>
    %52 = arith.addf %51, %50 : vector<8x128xf32>
    %c0_25 = arith.constant 0 : index
    %c0_26 = arith.constant 0 : index
    %53 = vector.load %arg5[%c0_25, %c0_26] : memref<8x128xf32, #tpu.memory_space<vmem>>, vector<8x128xf32>
    tpu.vector_store %arg5[%c0_25, %c0_26], %52 {strides = array<i32>} : memref<8x128xf32, #tpu.memory_space<vmem>>, vector<8x128xf32>,
    %c0_i32_27 = arith.constant 0 : i32
    %54 = arith.cmpi eq, %arg1, %c0_i32_27 : i32
    %55 = arith.extui %54 : i1 to i32
    %c0_i32_28 = arith.constant 0 : i32
    %56 = arith.cmpi ne, %55, %c0_i32_28 : i32
    scf.if %56 {
      %cst_29 = arith.constant 0.000000e+00 : f32
      %57 = vector.broadcast %cst_29 : f32 to vector<1x1x1xf32>
      %c0_30 = arith.constant 0 : index
      %c0_31 = arith.constant 0 : index
      %58 = vector.load %arg5[%c0_30, %c0_31] : memref<8x128xf32, #tpu.memory_space<vmem>>, vector<8x128xf32>
      %59 = vector.shape_cast %58 : vector<8x128xf32> to vector<1x8x128xf32>
      %cst_32 = arith.constant dense<0.000000e+00> : vector<1xf32>
      %60 = vector.multi_reduction <add>, %59, %cst_32 [1, 2] : vector<1x8x128xf32> to vector<1xf32>
      %61 = vector.shape_cast %60 : vector<1xf32> to vector<1x1x1xf32>
      %62 = vector.extract %61[0, 0, 0] : f32 from vector<1x1x1xf32>
      %63 = vector.broadcast %62 : f32 to vector<1x1x1xf32>
      %64 = arith.addf %57, %63 : vector<1x1x1xf32>
      %c0_33 = arith.constant 0 : index
      %c0_34 = arith.constant 0 : index
      %c0_35 = arith.constant 0 : index
      %65 = vector.load %arg4[%c0_33, %c0_34, %c0_35] : memref<1x1x1xf32, #tpu.memory_space<vmem>>, vector<1x1x1xf32>
      tpu.vector_store %arg4[%c0_33, %c0_34, %c0_35], %64 {strides = array<i32>} : memref<1x1x1xf32, #tpu.memory_space<vmem>>, vector<1x1x1xf32>,
    } else {
    }
    return
  }
  func.func @transform_0(%arg0: i32, %arg1: i32) -> (i32, i32, i32) {
    %c1_i32 = arith.constant 1 : i32
    %0 = arith.muli %arg0, %c1_i32 : i32
    %1 = arith.addi %0, %arg1 : i32
    %c0_i32 = arith.constant 0 : i32
    %c0_i32_0 = arith.constant 0 : i32
    %c0_i32_1 = arith.constant 0 : i32
    return %c0_i32, %1, %c0_i32_0 : i32, i32, i32
  }
  func.func @transform_1(%arg0: i32, %arg1: i32) -> (i32, i32, i32) {
    %c1_i32 = arith.constant 1 : i32
    %0 = arith.muli %arg0, %c1_i32 : i32
    %1 = arith.addi %0, %arg1 : i32
    %c0_i32 = arith.constant 0 : i32
    %c0_i32_0 = arith.constant 0 : i32
    %c0_i32_1 = arith.constant 0 : i32
    return %c0_i32, %1, %c0_i32_0 : i32, i32, i32
  }
  func.func @transform_2(%arg0: i32, %arg1: i32) -> (i32, i32, i32) {
    %c0_i32 = arith.constant 0 : i32
    %c0_i32_0 = arith.constant 0 : i32
    %c0_i32_1 = arith.constant 0 : i32
    return %arg0, %c0_i32, %c0_i32_0 : i32, i32, i32
  }
}

</mosaic_0001>

<bundles_post_ra>
// kernel: tpu_custom_call.1
= control target key start
LH: loop header
LB: loop body
LE: loop exit
PB: predicated region body
PF: predicated region fallthrough
CT: control target
= control target key end

     0   :  { %7 = vsyncpa [#allocation4], 0  ;;  %s272_s0 = inlined_call_operand.hbm [shape: f32[4,8,128], index: 0, kind: input, shape index: {}]   ;;  %s273_s1 = inlined_call_operand.hbm [shape: f32[4,8,128], index: 1, kind: input, shape index: {}]   ;;  %s274_s2 = inlined_call_operand.hbm [shape: f32[1,1,1], index: 2, kind: output, shape index: {}]  }
   0x1   :  { %8 = vsyncpa [#allocation7], 0 }
   0x2   :  { %9 = vsyncpa [#allocation5], 0  ;;  %s216_s9 = smov [#allocation3]   ;;  %s144_s13 = scalar_lea.hbm %s272_s0, 512 }
   0x3   :  { %s18_s10 = sshll.u32 %s216_s9, 4  ;;  %p145_p0 = scmp.ne.s32.totalorder %s272_s0, %s144_s13  ;;  %s19_s10 = int_to_ptr.vmem [resolvable:$true] %s18_s10 }
   0x4   :  { %p148_p1 = scmp.lt.u32.totalorder %s144_s13, %s272_s0 }
   0x6   :  { %p150_p2 = pnand %p148_p1, %p145_p0 }
   0x8   :  { %153 = shalt.err (!%p150_p2)
}
   0x9   :  { %s154_s18 = scalar_lea.vmem %s19_s10, 512  ;;  %p159_p4 = scmp.lt.s32.totalorder %s19_s10, %s19_s10 }
   0xa   :  { %p155_p3 = scmp.ne.s32.totalorder %s19_s10, %s154_s18  ;;  %p160_p5 = scmp.lt.s32.totalorder %s154_s18, %s154_s18 }
   0xc   :  { %p161_p6 = por %p160_p5, %p159_p4 }
   0xe   :  { %p162_p7 = pnand %p161_p6, %p155_p3 }
  0x10   :  { %165 = shalt.err (!%p162_p7)
}
  0x11   :  { %s217_s19 = smov 128   ;;  %s218_s20 = smov 8  }
  0x12   :  { %24 = dma.hbm_to_vmem [thread:$0]  %s272_s0, 512, %s19_s10, [#allocation4], %s217_s19, %s217_s19, %s218_s20  }
  0x13   :  { %s219_s23 = smov [#allocation6]   ;;  %s166_s27 = scalar_lea.hbm %s273_s1, 512 }
  0x14   :  { %s33_s24 = sshll.u32 %s219_s23, 4  ;;  %p167_p8 = scmp.ne.s32.totalorder %s273_s1, %s166_s27  ;;  %s34_s24 = int_to_ptr.vmem [resolvable:$true] %s33_s24 }
  0x15   :  { %p170_p9 = scmp.lt.u32.totalorder %s166_s27, %s273_s1 }
  0x17   :  { %p172_p10 = pnand %p170_p9, %p167_p8 }
  0x19   :  { %175 = shalt.err (!%p172_p10)
}
  0x1a   :  { %s176_s4 = scalar_lea.vmem %s34_s24, 512  ;;  %p181_p12 = scmp.lt.s32.totalorder %s34_s24, %s34_s24 }
  0x1b   :  { %p177_p11 = scmp.ne.s32.totalorder %s34_s24, %s176_s4  ;;  %p182_p13 = scmp.lt.s32.totalorder %s176_s4, %s176_s4 }
  0x1d   :  { %p183_p0 = por %p182_p13, %p181_p12 }
  0x1f   :  { %p184_p1 = pnand %p183_p0, %p177_p11 }
  0x21   :  { %187 = shalt.err (!%p184_p1)
}
  0x22   :  { %39 = dma.hbm_to_vmem [thread:$0]  %s273_s1, 512, %s34_s24, [#allocation7], %s217_s19, %s217_s19, %s218_s20  }
  0x23   :  { %210 = dma.done.wait [#allocation4], 512  }
  0x24   :  { %211 = vsyncadd [#allocation4], 4294966784 }
  0x25   :  { %212 = dma.done.wait [#allocation7], 512  }
  0x26   :  { %213 = vsyncadd [#allocation7], 4294966784  ;;  %v53_v0 = vld [vmem:[#allocation3] sm:$0xff]  ;;  %v55_v1 = vld [vmem:[#allocation3 + $0x8] sm:$0xff]  ;;  %s220_s1 = smov [#allocation8]   ;;  %vm115_vm0 = vcmask 0  }
  0x27   :  { %v57_v2 = vld [vmem:[#allocation3 + $0x10] sm:$0xff]  ;;  %v59_v3 = vld [vmem:[#allocation3 + $0x18] sm:$0xff]  ;;  %v60_v4 = vld [vmem:[#allocation6] sm:$0xff]  ;;  %s123_s6 = sshll.u32 %s220_s1, 4  ;;  %s124_s6 = int_to_ptr.vmem [resolvable:$true] %s123_s6 }
  0x28   :  { %v62_v5 = vld [vmem:[#allocation6 + $0x8] sm:$0xff]  ;;  %v70_v6 = vsub.f32 %v57_v2, %v53_v0  ;;  %v64_v7 = vld [vmem:[#allocation6 + $0x10] sm:$0xff]  ;;  %v66_v8 = vld [vmem:[#allocation6 + $0x18] sm:$0xff]  ;;  %v71_v9 = vsub.f32 %v59_v3, %v55_v1  ;;  %v74_v10 = vmax.f32 %v53_v0, %v60_v4  ;;  %v80_v12 = vmin.f32 %v53_v0, %v60_v4  ;;  %s188_s8 = scalar_lea.vmem %s124_s6, 16  ;;  %s192_s9 = scalar_lea.vmem %s124_s6, 32 }
  0x29   :  { %v77_v11 = vmax.f32 %v55_v1, %v62_v5  ;;  %v67_v13 = vsub.f32 %v64_v7, %v60_v4  ;;  %v68_v14 = vsub.f32 %v66_v8, %v62_v5  ;;  %v73_v15 = vmin.f32 %v57_v2, %v64_v7  ;;  %p189_p2 = scmp.ne.s32.totalorder %s124_s6, %s188_s8  ;;  %p193_p3 = scmp.lt.s32.totalorder %s124_s6, %s124_s6 }
  0x2a   :  { %v76_v16 = vmin.f32 %v59_v3, %v66_v8  ;;  %v72_v17 = vmul.f32 %v71_v9, %v70_v6  ;;  %v79_v18 = vmax.f32 %v57_v2, %v64_v7  ;;  %v82_v19 = vmax.f32 %v59_v3, %v66_v8  ;;  %p194_p4 = scmp.lt.s32.totalorder %s192_s9, %s188_s8 }
  0x2b   :  { %v69_v20 = vmul.f32 %v68_v14, %v67_v13  ;;  %v75_v21 = vsub.f32 %v73_v15, %v74_v10 }
  0x2c   :  { %v78_v22 = vsub.f32 %v76_v16, %v77_v11  ;;  %v81_v23 = vsub.f32 %v79_v18, %v80_v12  ;;  %v83_v24 = vsub.f32 %v82_v19, %v80_v12  ;;  %p195_p5 = por %p194_p4, %p193_p3 }
  0x2d   :  { %v86_v26 = vadd.f32 %v72_v17, %v69_v20 }
  0x2e   :  { %v85_v25 = vmul.f32 %v78_v22, %v75_v21  ;;  %v84_v27 = vmul.f32 %v83_v24, %v81_v23  ;;  %p196_p6 = pnand %p195_p5, %p189_p2 }
  0x30   :  { %v87_v28 = vsub.f32 %v86_v26, %v85_v25  ;;  %140 = vrcp.f32 %v84_v27  ;;  %v88_v32 = vadd.f32 1.0, %v85_v25 }
  0x32   :  { %v89_v29 = vadd.f32 1.0, %v87_v28  ;;  %v92_v30 = vsub.f32 %v84_v27, %v87_v28 }
  0x34   :  { %142 = vrcp.f32 %v89_v29 }
  0x3a   :  { %v141_v31 = vpop.eup %140 }
  0x3b   :  { %v94_v33 = vmul.f32 %v141_v31, %v92_v30 }
  0x3e   :  { %v143_v34 = vpop.eup %142 }
  0x3f   :  { %v91_v35 = vmul.f32 %v143_v34, %v88_v32 }
  0x41   :  { %v95_v36 = vsub.f32 %v91_v35, %v94_v33 }
  0x43   :  { %v96_v37 = vsub.f32 1.0, %v95_v36 }
  0x45   :  { %104 = vadd.xlane.f32.xlu0 %v96_v37 }
  0xd2   :  { %v105_v38 = vpop.xlane.xlu0 %104 }
  0xd3   :  { %v106_v39 = vrot.slane %v105_v38, 4 }
  0xd5   :  { %v107_v40 = vadd.f32 %v106_v39, %v105_v38 }
  0xd7   :  { %v108_v41 = vrot.slane %v107_v40, 2 }
  0xd9   :  { %v109_v42 = vadd.f32 %v108_v41, %v107_v40 }
  0xdb   :  { %v110_v43 = vrot.slane %v109_v42, 1 }
  0xdd   :  { %v111_v44 = vadd.f32 %v110_v43, %v109_v42 }
  0xdf   :  { %133 = vpush %v111_v44 }
 0x110   :  { %s134_s7 = spop %133 }
 0x111   :  { %v113_v45 = vstv %s134_s7 }
 0x112   :  { %116 = vst.msk [vmem:[#allocation8] sm:$0x1] %vm115_vm0, %v113_v45 }
 0x113   :  { %199 = shalt.err (!%p196_p6)
}
 0x114   :  { %s200_s12 = scalar_lea.hbm %s274_s2, 16 }
 0x115   :  { %p201_p7 = scmp.ne.s32.totalorder %s274_s2, %s200_s12  ;;  %p204_p8 = scmp.lt.u32.totalorder %s200_s12, %s274_s2 }
 0x117   :  { %p206_p9 = pnand %p204_p8, %p201_p7 }
 0x119   :  { %209 = shalt.err (!%p206_p9)
}
 0x11a   :  { %126 = dma.vmem_to_hbm [thread:$0]  %s124_s6, 16, %s274_s2, [#allocation5]  }
 0x11b   :  { %214 = dma.done.wait [#allocation5], 16  }
 0x11c   :  { %215 = vsyncadd [#allocation5], 4294967280 }
 0x11d   :  { %130 = vsyncpa [#allocation4], 1 }
 0x11e   :  { %131 = vsyncpa [#allocation7], 1 }
 0x11f   :  { %132 = vsyncpa [#allocation5], 1 }

</bundles_post_ra>
